<compile_context>
chip_gen: v7x
topology: tpu7x:2x2x1
jax: 0.10.0
libtpu: 0.0.40
codegen_flags: <defaults>
</compile_context>

<pallas_src>
import functools

import jax
import jax.numpy as jnp
from jax.experimental import pallas as pl
from jax.experimental.pallas import tpu as pltpu


def _brc_kernel(x_ref, h0_ref, u_ref, w_ref, y_ref,
                h_scratch, pa_ref, pb_ref, *, ts, tanh_dtype):
    # x_ref:   (Tc, Bb, Ip) f32   input chunk; channel Ip-1 is constant 1.0
    #                             (folds the biases into the matmul).
    # h0_ref:  (Bb, Hp)           initial hidden state (grid-invariant).
    # u_ref:   (Ip, 3*Hp)         fused [0.5*U_c | U_a | U_h] with bias row
    #                             [0.5*b_c | b_a | b_h] at row Ip-1.
    # w_ref:   (8, Hp)            row 0: 0.5*w_c, row 1: w_a, rest zero.
    # y_ref:   (Tc, Bb, Hp)       output chunk.
    # h_scratch: (Bb, Hp) f32     hidden state carried across time chunks.
    #   NOTE: this carry is only correct because the time axis is the
    #   innermost, "arbitrary" grid axis and scratch is per-core; do not
    #   reorder the grid or mark the time axis "parallel".
    # pa_ref / pb_ref: (ts*Bb, 3*Hp) f32  projection double-buffer.
    Tc, Bb, Ip = x_ref.shape
    Hp = h_scratch.shape[1]
    n_sub = Tc // ts                       # static, even by construction

    @pl.when(pl.program_id(1) == 0)
    def _():
        h_scratch[...] = h0_ref[...]

    # Gate parameters as (1, Hp) rows -- sublane-broadcast at use.
    wc = w_ref[0:1, :]                     # 0.5 * w_c
    wa = w_ref[1:2, :]                     # w_a

    def _hint(i, m):
        return i if isinstance(i, int) else pl.multiple_of(i, m)

    def project(j, dst_ref):
        # One fused MXU matmul for sub-chunk j: [xc' | xa' | xh'] pre-biased.
        start = _hint(j * ts, ts)
        u = u_ref[...]
        xs = x_ref[pl.ds(start, ts), :, :].reshape(ts * Bb, Ip).astype(u.dtype)
        dst_ref[...] = jnp.dot(xs, u, preferred_element_type=jnp.float32)

    def gates(j, src_ref, h):
        # Serial recurrence over one sub-chunk; pure VPU/EUP work.
        base = j * ts

        def step(t, h):
            row = _hint(t * Bb, Bb)
            p = src_ref[pl.ds(row, Bb), :]                 # (Bb, 3*Hp)
            xc = p[:, 0:Hp]
            xa = p[:, Hp:2 * Hp]
            xh = p[:, 2 * Hp:3 * Hp]
            tc = jnp.tanh((xc + wc * h).astype(tanh_dtype)).astype(jnp.float32)
            c = 0.5 * tc + 0.5                             # == sigmoid(arg)
            a = 1.0 + jnp.tanh((xa + wa * h).astype(tanh_dtype)
                               ).astype(jnp.float32)
            g = jnp.tanh((xh + a * h).astype(tanh_dtype)).astype(jnp.float32)
            h = g + c * (h - g)                            # == c*h + (1-c)*g
            y_ref[base + t] = h.astype(y_ref.dtype)
            return h

        # Fully unrolled so the sub-chunk (and the next sub-chunk's matmul
        # issued just above it) lives in one scheduling region.
        return jax.lax.fori_loop(0, ts, step, h, unroll=True)

    # Prime buffer A with sub-chunk 0 (the only non-overlapped matmul).
    project(0, pa_ref)

    def pair(i, h):
        j0 = 2 * i
        # Matmul for sub-chunk j0+1 (buffer B) overlaps the gate loop over
        # sub-chunk j0 (buffer A) and vice versa.  The last pair redundantly
        # re-projects the final sub-chunk (cheap) so no scf.if splits the
        # scheduling region.
        project(j0 + 1, pb_ref)
        h = gates(j0, pa_ref, h)
        project(jnp.minimum(j0 + 2, n_sub - 1), pa_ref)
        h = gates(j0 + 1, pb_ref, h)
        return h

    h_scratch[...] = jax.lax.fori_loop(0, n_sub // 2, pair, h_scratch[...])


def _round_up(x, m):
    return (x + m - 1) // m * m


def _cdiv(a, b):
    return (a + b - 1) // b


def _vmem_capacity_bytes():
    # Generation-aware VMEM capacity: 128 MiB on v5e/v6e, 64 MiB per core on
    # v7x.  Fall back to the smallest (v7x) figure if the query is missing.
    try:
        return int(pltpu.get_tpu_info().vmem_capacity_bytes)
    except Exception:
        return 64 * 1024 * 1024


@functools.partial(jax.jit,
                   static_argnames=("matmul_dtype", "out_dtype", "tanh_dtype"))
def brc_forward(x_seq, h0, params, *, matmul_dtype=jnp.float32,
                out_dtype=jnp.float32, tanh_dtype=jnp.float32):
    """x_seq: (S, B, I); h0: (B, H); params: dict of BRC weights.

    matmul_dtype: MXU dtype for the fused x-projection (bf16 recommended for
                  inference on all generations).
    out_dtype:    dtype of the y stream written back to HBM.
    tanh_dtype:   dtype of the tanh arguments (bf16 halves EUP time on
                  v6e/v7x; keep f32 on v5e).  The recurrence stays f32.
    """
    S, B, I = x_seq.shape
    H = h0.shape[1]

    # ---- lane/sublane-aligned padding --------------------------------------
    Bp = _round_up(B, 8)
    Hp = _round_up(H, 128)
    Ip = I + 1                      # extra ones channel folds the biases in

    # ---- batch blocking ------------------------------------------------------
    # Cap Bb so the live gate working set (~6 arrays of (Bb, Hp) f32) fits the
    # 64-entry vreg file; only split the batch when the cap requires it (the
    # leading "parallel" grid axis also feeds both v7x TensorCores).
    bb_cap = max(8, (8192 // Hp) // 8 * 8)
    Bb = min(Bp, bb_cap)
    while Bp % Bb != 0:
        Bb -= 8
    NB = Bp // Bb

    # ---- VMEM-budgeted time chunking -----------------------------------------
    usz = jnp.finfo(matmul_dtype).bits // 8
    ysz = jnp.finfo(out_dtype).bits // 8
    cap = _vmem_capacity_bytes()
    vmem_limit = int(min(cap - 12 * 2**20, int(cap * 0.85)))
    ts_target = 16
    resident = (2 * Ip * 3 * Hp * usz              # fused U (double-buffered)
                + 2 * Bb * Hp * 4                  # h0
                + 2 * 8 * Hp * 4                   # w pack
                + Bb * Hp * 4                      # carried h
                + 2 * ts_target * Bb * 3 * Hp * 4)  # proj double-buffer
    per_t = Bb * (2 * Ip * 4 + 2 * Hp * ysz)       # double-buffered x & y
    budget = vmem_limit - 2 * 2**20 - resident
    tc_cap = int(min(max(budget // per_t, 2), 2048))

    nt0 = _cdiv(S, tc_cap)
    tc_raw = _cdiv(S, nt0)                         # minimize padded timesteps
    Ts = max(1, min(ts_target, (tc_raw + 1) // 2))
    Tc = _round_up(tc_raw, 2 * Ts)                 # even sub-chunk count
    S_pad = _round_up(S, Tc)
    NT = S_pad // Tc

    # ---- pack operands -------------------------------------------------------
    # Zero-pad inputs.  Channel Ip-1 of x is 1.0 so the matmul adds the biases;
    # zero weights/biases in padded hidden columns keep padded lanes at zero.
    x_p = jnp.zeros((S_pad, Bp, Ip), jnp.float32)
    x_p = x_p.at[:S, :B, :I].set(x_seq.astype(jnp.float32))
    x_p = x_p.at[:, :, I].set(1.0)
    h0_p = jnp.zeros((Bp, Hp), jnp.float32).at[:B, :H].set(
        h0.astype(jnp.float32))

    def pack_u(u, b, scale):
        # (H, I) weight + (H,) bias -> (Ip, Hp) block of [x|1] @ [scale*U^T; scale*b]
        blk = jnp.zeros((Ip, Hp), jnp.float32)
        blk = blk.at[:I, :H].set(scale * u.T)
        blk = blk.at[I, :H].set(scale * b)
        return blk

    u_fused = jnp.concatenate(
        [pack_u(params["U_c"], params["b_c"], 0.5),   # 0.5: sigmoid -> tanh
         pack_u(params["U_a"], params["b_a"], 1.0),
         pack_u(params["U_h"], params["b_h"], 1.0)],
        axis=1).astype(matmul_dtype)                  # (Ip, 3*Hp)

    w_pack = jnp.zeros((8, Hp), jnp.float32)
    w_pack = w_pack.at[0, :H].set(0.5 * params["w_c"])
    w_pack = w_pack.at[1, :H].set(params["w_a"])

    kernel = functools.partial(_brc_kernel, ts=Ts, tanh_dtype=tanh_dtype)
    y_p = pl.pallas_call(
        kernel,
        out_shape=jax.ShapeDtypeStruct((S_pad, Bp, Hp), out_dtype),
        grid_spec=pltpu.PrefetchScalarGridSpec(
            num_scalar_prefetch=0,
            # Time MUST stay the innermost "arbitrary" axis: h is carried
            # across it in per-core VMEM scratch.
            grid=(NB, NT),
            in_specs=[
                pl.BlockSpec((Tc, Bb, Ip), lambda b, t: (t, b, 0)),   # x chunk
                pl.BlockSpec((Bb, Hp), lambda b, t: (b, 0)),          # h0
                pl.BlockSpec((Ip, 3 * Hp), lambda b, t: (0, 0)),      # fused U
                pl.BlockSpec((8, Hp), lambda b, t: (0, 0)),           # w pack
            ],
            out_specs=pl.BlockSpec((Tc, Bb, Hp), lambda b, t: (t, b, 0)),
            scratch_shapes=[
                pltpu.VMEM((Bb, Hp), jnp.float32),             # carried h
                pltpu.VMEM((Ts * Bb, 3 * Hp), jnp.float32),    # proj buffer A
                pltpu.VMEM((Ts * Bb, 3 * Hp), jnp.float32),    # proj buffer B
            ],
        ),
        compiler_params=pltpu.CompilerParams(
            dimension_semantics=("parallel", "arbitrary"),
            vmem_limit_bytes=vmem_limit,
        ),
    )(x_p, h0_p, u_fused, w_pack)

    y_seq = y_p[:S, :B, :H]
    hn = y_p[S - 1, :B, :H]        # final hidden state == last valid output
    return y_seq, hn


def init_brc_params(key, input_size, hidden_size):
    """Deterministic parameter init matching the PyTorch shapes."""
    ks = jax.random.split(key, 8)
    bound = (6.0 / (input_size + hidden_size)) ** 0.5   # xavier-uniform
    return {
        "U_c": jax.random.uniform(ks[0], (hidden_size, input_size),
                                  jnp.float32, -bound, bound),
        "w_c": jax.random.normal(ks[1], (hidden_size,), jnp.float32),
        "b_c": jax.random.normal(ks[2], (hidden_size,), jnp.float32),
        "U_a": jax.random.uniform(ks[3], (hidden_size, input_size),
                                  jnp.float32, -bound, bound),
        "w_a": jax.random.normal(ks[4], (hidden_size,), jnp.float32),
        "b_a": jax.random.normal(ks[5], (hidden_size,), jnp.float32),
        "U_h": jax.random.uniform(ks[6], (hidden_size, input_size),
                                  jnp.float32, -bound, bound),
        "b_h": jax.random.normal(ks[7], (hidden_size,), jnp.float32),
    }


def brc_reference(x_seq, h0, params):
    """Pure-JAX reference (mirrors the PyTorch loop) for validation."""
    U_c, U_a, U_h = params["U_c"], params["U_a"], params["U_h"]
    w_c, b_c = params["w_c"], params["b_c"]
    w_a, b_a = params["w_a"], params["b_a"]
    b_h = params["b_h"]

    def step(h, x):
        c = jax.nn.sigmoid(x @ U_c.T + w_c * h + b_c)
        a = 1.0 + jnp.tanh(x @ U_a.T + w_a * h + b_a)
        h = c * h + (1.0 - c) * jnp.tanh(x @ U_h.T + a * h + b_h)
        return h, h

    hn, ys = jax.lax.scan(step, h0, x_seq)
    return ys, hn


if __name__ == "__main__":
    seq_len, batch, input_size, hidden_size = 8, 4, 8, 32

    key = jax.random.PRNGKey(0)
    k_x, k_h, k_p = jax.random.split(key, 3)

    x_seq = jax.random.normal(k_x, (seq_len, batch, input_size), jnp.float32)
    h0 = jax.random.normal(k_h, (batch, hidden_size), jnp.float32)
    params = init_brc_params(k_p, input_size, hidden_size)

    # Reference-precision path (f32 everywhere).
    y_seq, hn = brc_forward(x_seq, h0, params)
    jax.block_until_ready((y_seq, hn))

    y_ref, hn_ref = brc_reference(x_seq, h0, params)
    assert y_seq.shape == (seq_len, batch, hidden_size)
    assert hn.shape == (batch, hidden_size)
    assert jnp.allclose(y_seq, y_ref, atol=1e-4, rtol=1e-4)
    assert jnp.allclose(hn, hn_ref, atol=1e-4, rtol=1e-4)

    # Fast inference path: bf16 MXU inputs and bf16 tanh arguments (v6e/v7x
    # EUP).  The recurrence stays f32; the precision contract is relaxed, so
    # only smoke-check this path.
    y_bf, hn_bf = brc_forward(x_seq, h0, params,
                              matmul_dtype=jnp.bfloat16,
                              tanh_dtype=jnp.bfloat16)
    jax.block_until_ready((y_bf, hn_bf))
    assert y_bf.shape == (seq_len, batch, hidden_size)
    assert bool(jnp.all(jnp.isfinite(y_bf)))
    assert bool(jnp.all(jnp.isfinite(hn_bf)))

    print("KERNEL_OK")
</pallas_src>

<mosaic_0001>
module attributes {stable_mosaic.version = 11 : i64} {
  func.func @_brc_kernel(%arg0: i32, %arg1: i32, %arg2: memref<8x8x9xf32, #tpu.memory_space<vmem>>, %arg3: memref<8x128xf32, #tpu.memory_space<vmem>>, %arg4: memref<9x384xf32, #tpu.memory_space<vmem>>, %arg5: memref<8x128xf32, #tpu.memory_space<vmem>>, %arg6: memref<8x8x128xf32, #tpu.memory_space<vmem>>, %arg7: memref<8x128xf32, #tpu.memory_space<vmem>>, %arg8: memref<32x384xf32, #tpu.memory_space<vmem>>, %arg9: memref<32x384xf32, #tpu.memory_space<vmem>>) attributes {dimension_semantics = [#tpu.dimension_semantics<parallel>, #tpu.dimension_semantics<arbitrary>], iteration_bounds = array<i64: 1, 1>, scalar_prefetch = 0 : i64, scratch_operands = 3 : i64, tpu.core_type = #tpu.core_type<tc>, window_params = [{transform_indices = @transform_0, window_bounds = array<i64: 8, 8, 9>}, {transform_indices = @transform_1, window_bounds = array<i64: 8, 128>}, {pipeline_mode = #tpu.pipeline_mode<synchronous>, transform_indices = @transform_2, window_bounds = array<i64: 9, 384>}, {pipeline_mode = #tpu.pipeline_mode<synchronous>, transform_indices = @transform_3, window_bounds = array<i64: 8, 128>}, {transform_indices = @transform_4, window_bounds = array<i64: 8, 8, 128>}]} {
    %c0_i32 = arith.constant 0 : i32
    %0 = arith.cmpi eq, %arg1, %c0_i32 : i32
    %1 = arith.extui %0 : i1 to i32
    %c0_i32_0 = arith.constant 0 : i32
    %2 = arith.cmpi ne, %1, %c0_i32_0 : i32
    scf.if %2 {
      %c0_100 = arith.constant 0 : index
      %c0_101 = arith.constant 0 : index
      %291 = vector.load %arg3[%c0_100, %c0_101] : memref<8x128xf32, #tpu.memory_space<vmem>>, vector<8x128xf32>
      %c0_102 = arith.constant 0 : index
      %c0_103 = arith.constant 0 : index
      %292 = vector.load %arg7[%c0_102, %c0_103] : memref<8x128xf32, #tpu.memory_space<vmem>>, vector<8x128xf32>
      tpu.vector_store %arg7[%c0_102, %c0_103], %291 {strides = array<i32>} : memref<8x128xf32, #tpu.memory_space<vmem>>, vector<8x128xf32>,
    } else {
    }
    %c0 = arith.constant 0 : index
    %c0_1 = arith.constant 0 : index
    %3 = vector.load %arg5[%c0, %c0_1] : memref<8x128xf32, #tpu.memory_space<vmem>>, vector<1x128xf32>
    %c1 = arith.constant 1 : index
    %c0_2 = arith.constant 0 : index
    %4 = vector.load %arg5[%c1, %c0_2] : memref<8x128xf32, #tpu.memory_space<vmem>>, vector<1x128xf32>
    %c0_3 = arith.constant 0 : index
    %c0_4 = arith.constant 0 : index
    %5 = vector.load %arg4[%c0_3, %c0_4] : memref<9x384xf32, #tpu.memory_space<vmem>>, vector<9x384xf32>
    %c0_5 = arith.constant 0 : index
    %c0_6 = arith.constant 0 : index
    %c0_7 = arith.constant 0 : index
    %6 = vector.load %arg2[%c0_5, %c0_6, %c0_7] : memref<8x8x9xf32, #tpu.memory_space<vmem>>, vector<4x8x9xf32>
    %7 = vector.shape_cast %6 : vector<4x8x9xf32> to vector<32x9xf32>
    %cst = arith.constant dense<0.000000e+00> : vector<32x384xf32>
    %8 = tpu.matmul %7, %5, %cst {dimension_numbers = #tpu.dot_dimension_numbers<[1], [0], [0], [1], [0, 0, 1, 1], [], []>} : vector<32x9xf32>, vector<9x384xf32>, vector<32x384xf32> -> vector<32x384xf32>
    %c0_8 = arith.constant 0 : index
    %c0_9 = arith.constant 0 : index
    %9 = vector.load %arg8[%c0_8, %c0_9] : memref<32x384xf32, #tpu.memory_space<vmem>>, vector<32x384xf32>
    tpu.vector_store %arg8[%c0_8, %c0_9], %8 {strides = array<i32>} : memref<32x384xf32, #tpu.memory_space<vmem>>, vector<32x384xf32>,
    %c0_10 = arith.constant 0 : index
    %c0_11 = arith.constant 0 : index
    %10 = vector.load %arg7[%c0_10, %c0_11] : memref<8x128xf32, #tpu.memory_space<vmem>>, vector<8x128xf32>
    %c0_i32_12 = arith.constant 0 : i32
    %c2_i32 = arith.constant 2 : i32
    %11 = arith.muli %c2_i32, %c0_i32_12 : i32
    %c1_i32 = arith.constant 1 : i32
    %12 = arith.addi %11, %c1_i32 : i32
    %c4_i32 = arith.constant 4 : i32
    %13 = arith.muli %12, %c4_i32 : i32
    %14 = tpu.assume_multiple %13, 4 : i32
    %c0_13 = arith.constant 0 : index
    %c0_14 = arith.constant 0 : index
    %15 = vector.load %arg4[%c0_13, %c0_14] : memref<9x384xf32, #tpu.memory_space<vmem>>, vector<9x384xf32>
    %16 = arith.index_cast %14 : i32 to index
    %c0_15 = arith.constant 0 : index
    %c0_16 = arith.constant 0 : index
    %17 = vector.load %arg2[%16, %c0_15, %c0_16] : memref<8x8x9xf32, #tpu.memory_space<vmem>>, vector<4x8x9xf32>
    %18 = vector.shape_cast %17 : vector<4x8x9xf32> to vector<32x9xf32>
    %cst_17 = arith.constant dense<0.000000e+00> : vector<32x384xf32>
    %19 = tpu.matmul %18, %15, %cst_17 {dimension_numbers = #tpu.dot_dimension_numbers<[1], [0], [0], [1], [0, 0, 1, 1], [], []>} : vector<32x9xf32>, vector<9x384xf32>, vector<32x384xf32> -> vector<32x384xf32>
    %c0_18 = arith.constant 0 : index
    %c0_19 = arith.constant 0 : index
    %20 = vector.load %arg9[%c0_18, %c0_19] : memref<32x384xf32, #tpu.memory_space<vmem>>, vector<32x384xf32>
    tpu.vector_store %arg9[%c0_18, %c0_19], %19 {strides = array<i32>} : memref<32x384xf32, #tpu.memory_space<vmem>>, vector<32x384xf32>,
    %c4_i32_20 = arith.constant 4 : i32
    %21 = arith.muli %11, %c4_i32_20 : i32
    %c0_i32_21 = arith.constant 0 : i32
    %c8_i32 = arith.constant 8 : i32
    %22 = arith.muli %c0_i32_21, %c8_i32 : i32
    %23 = tpu.assume_multiple %22, 8 : i32
    %24 = arith.index_cast %23 : i32 to index
    %c0_22 = arith.constant 0 : index
    %25 = vector.load %arg8[%24, %c0_22] : memref<32x384xf32, #tpu.memory_space<vmem>>, vector<8x384xf32>
    %26 = vector.extract_strided_slice %25 {offsets = [0, 0], sizes = [8, 128], strides = [1, 1]} : vector<8x384xf32> to vector<8x128xf32>
    %27 = vector.extract_strided_slice %25 {offsets = [0, 128], sizes = [8, 128], strides = [1, 1]} : vector<8x384xf32> to vector<8x128xf32>
    %28 = vector.extract_strided_slice %25 {offsets = [0, 256], sizes = [8, 128], strides = [1, 1]} : vector<8x384xf32> to vector<8x128xf32>
    %29 = vector.broadcast %3 : vector<1x128xf32> to vector<8x128xf32>
    %30 = arith.mulf %29, %10 : vector<8x128xf32>
    %31 = arith.addf %26, %30 : vector<8x128xf32>
    %32 = math.tanh %31 : vector<8x128xf32>
    %cst_23 = arith.constant 5.000000e-01 : f32
    %33 = vector.broadcast %cst_23 : f32 to vector<8x128xf32>
    %34 = arith.mulf %33, %32 : vector<8x128xf32>
    %cst_24 = arith.constant 5.000000e-01 : f32
    %35 = vector.broadcast %cst_24 : f32 to vector<8x128xf32>
    %36 = arith.addf %34, %35 : vector<8x128xf32>
    %37 = vector.broadcast %4 : vector<1x128xf32> to vector<8x128xf32>
    %38 = arith.mulf %37, %10 : vector<8x128xf32>
    %39 = arith.addf %27, %38 : vector<8x128xf32>
    %40 = math.tanh %39 : vector<8x128xf32>
    %cst_25 = arith.constant 1.000000e+00 : f32
    %41 = vector.broadcast %cst_25 : f32 to vector<8x128xf32>
    %42 = arith.addf %41, %40 : vector<8x128xf32>
    %43 = arith.mulf %42, %10 : vector<8x128xf32>
    %44 = arith.addf %28, %43 : vector<8x128xf32>
    %45 = math.tanh %44 : vector<8x128xf32>
    %46 = arith.subf %10, %45 : vector<8x128xf32>
    %47 = arith.mulf %36, %46 : vector<8x128xf32>
    %48 = arith.addf %45, %47 : vector<8x128xf32>
    %49 = arith.addi %21, %c0_i32_21 : i32
    %50 = arith.index_cast %49 : i32 to index
    %c0_26 = arith.constant 0 : index
    %c0_27 = arith.constant 0 : index
    %51 = vector.load %arg6[%50, %c0_26, %c0_27] : memref<8x8x128xf32, #tpu.memory_space<vmem>>, vector<1x8x128xf32>
    %52 = vector.shape_cast %51 : vector<1x8x128xf32> to vector<8x128xf32>
    %53 = vector.shape_cast %48 : vector<8x128xf32> to vector<1x8x128xf32>
    tpu.vector_store %arg6[%50, %c0_26, %c0_27], %53 {strides = array<i32>} : memref<8x8x128xf32, #tpu.memory_space<vmem>>, vector<1x8x128xf32>,
    %c1_i32_28 = arith.constant 1 : i32
    %c8_i32_29 = arith.constant 8 : i32
    %54 = arith.muli %c1_i32_28, %c8_i32_29 : i32
    %55 = tpu.assume_multiple %54, 8 : i32
    %56 = arith.index_cast %55 : i32 to index
    %c0_30 = arith.constant 0 : index
    %57 = vector.load %arg8[%56, %c0_30] : memref<32x384xf32, #tpu.memory_space<vmem>>, vector<8x384xf32>
    %58 = vector.extract_strided_slice %57 {offsets = [0, 0], sizes = [8, 128], strides = [1, 1]} : vector<8x384xf32> to vector<8x128xf32>
    %59 = vector.extract_strided_slice %57 {offsets = [0, 128], sizes = [8, 128], strides = [1, 1]} : vector<8x384xf32> to vector<8x128xf32>
    %60 = vector.extract_strided_slice %57 {offsets = [0, 256], sizes = [8, 128], strides = [1, 1]} : vector<8x384xf32> to vector<8x128xf32>
    %61 = vector.broadcast %3 : vector<1x128xf32> to vector<8x128xf32>
    %62 = arith.mulf %61, %48 : vector<8x128xf32>
    %63 = arith.addf %58, %62 : vector<8x128xf32>
    %64 = math.tanh %63 : vector<8x128xf32>
    %cst_31 = arith.constant 5.000000e-01 : f32
    %65 = vector.broadcast %cst_31 : f32 to vector<8x128xf32>
    %66 = arith.mulf %65, %64 : vector<8x128xf32>
    %cst_32 = arith.constant 5.000000e-01 : f32
    %67 = vector.broadcast %cst_32 : f32 to vector<8x128xf32>
    %68 = arith.addf %66, %67 : vector<8x128xf32>
    %69 = vector.broadcast %4 : vector<1x128xf32> to vector<8x128xf32>
    %70 = arith.mulf %69, %48 : vector<8x128xf32>
    %71 = arith.addf %59, %70 : vector<8x128xf32>
    %72 = math.tanh %71 : vector<8x128xf32>
    %cst_33 = arith.constant 1.000000e+00 : f32
    %73 = vector.broadcast %cst_33 : f32 to vector<8x128xf32>
    %74 = arith.addf %73, %72 : vector<8x128xf32>
    %75 = arith.mulf %74, %48 : vector<8x128xf32>
    %76 = arith.addf %60, %75 : vector<8x128xf32>
    %77 = math.tanh %76 : vector<8x128xf32>
    %78 = arith.subf %48, %77 : vector<8x128xf32>
    %79 = arith.mulf %68, %78 : vector<8x128xf32>
    %80 = arith.addf %77, %79 : vector<8x128xf32>
    %81 = arith.addi %21, %c1_i32_28 : i32
    %82 = arith.index_cast %81 : i32 to index
    %c0_34 = arith.constant 0 : index
    %c0_35 = arith.constant 0 : index
    %83 = vector.load %arg6[%82, %c0_34, %c0_35] : memref<8x8x128xf32, #tpu.memory_space<vmem>>, vector<1x8x128xf32>
    %84 = vector.shape_cast %83 : vector<1x8x128xf32> to vector<8x128xf32>
    %85 = vector.shape_cast %80 : vector<8x128xf32> to vector<1x8x128xf32>
    tpu.vector_store %arg6[%82, %c0_34, %c0_35], %85 {strides = array<i32>} : memref<8x8x128xf32, #tpu.memory_space<vmem>>, vector<1x8x128xf32>,
    %c2_i32_36 = arith.constant 2 : i32
    %c8_i32_37 = arith.constant 8 : i32
    %86 = arith.muli %c2_i32_36, %c8_i32_37 : i32
    %87 = tpu.assume_multiple %86, 8 : i32
    %88 = arith.index_cast %87 : i32 to index
    %c0_38 = arith.constant 0 : index
    %89 = vector.load %arg8[%88, %c0_38] : memref<32x384xf32, #tpu.memory_space<vmem>>, vector<8x384xf32>
    %90 = vector.extract_strided_slice %89 {offsets = [0, 0], sizes = [8, 128], strides = [1, 1]} : vector<8x384xf32> to vector<8x128xf32>
    %91 = vector.extract_strided_slice %89 {offsets = [0, 128], sizes = [8, 128], strides = [1, 1]} : vector<8x384xf32> to vector<8x128xf32>
    %92 = vector.extract_strided_slice %89 {offsets = [0, 256], sizes = [8, 128], strides = [1, 1]} : vector<8x384xf32> to vector<8x128xf32>
    %93 = vector.broadcast %3 : vector<1x128xf32> to vector<8x128xf32>
    %94 = arith.mulf %93, %80 : vector<8x128xf32>
    %95 = arith.addf %90, %94 : vector<8x128xf32>
    %96 = math.tanh %95 : vector<8x128xf32>
    %cst_39 = arith.constant 5.000000e-01 : f32
    %97 = vector.broadcast %cst_39 : f32 to vector<8x128xf32>
    %98 = arith.mulf %97, %96 : vector<8x128xf32>
    %cst_40 = arith.constant 5.000000e-01 : f32
    %99 = vector.broadcast %cst_40 : f32 to vector<8x128xf32>
    %100 = arith.addf %98, %99 : vector<8x128xf32>
    %101 = vector.broadcast %4 : vector<1x128xf32> to vector<8x128xf32>
    %102 = arith.mulf %101, %80 : vector<8x128xf32>
    %103 = arith.addf %91, %102 : vector<8x128xf32>
    %104 = math.tanh %103 : vector<8x128xf32>
    %cst_41 = arith.constant 1.000000e+00 : f32
    %105 = vector.broadcast %cst_41 : f32 to vector<8x128xf32>
    %106 = arith.addf %105, %104 : vector<8x128xf32>
    %107 = arith.mulf %106, %80 : vector<8x128xf32>
    %108 = arith.addf %92, %107 : vector<8x128xf32>
    %109 = math.tanh %108 : vector<8x128xf32>
    %110 = arith.subf %80, %109 : vector<8x128xf32>
    %111 = arith.mulf %100, %110 : vector<8x128xf32>
    %112 = arith.addf %109, %111 : vector<8x128xf32>
    %113 = arith.addi %21, %c2_i32_36 : i32
    %114 = arith.index_cast %113 : i32 to index
    %c0_42 = arith.constant 0 : index
    %c0_43 = arith.constant 0 : index
    %115 = vector.load %arg6[%114, %c0_42, %c0_43] : memref<8x8x128xf32, #tpu.memory_space<vmem>>, vector<1x8x128xf32>
    %116 = vector.shape_cast %115 : vector<1x8x128xf32> to vector<8x128xf32>
    %117 = vector.shape_cast %112 : vector<8x128xf32> to vector<1x8x128xf32>
    tpu.vector_store %arg6[%114, %c0_42, %c0_43], %117 {strides = array<i32>} : memref<8x8x128xf32, #tpu.memory_space<vmem>>, vector<1x8x128xf32>,
    %c3_i32 = arith.constant 3 : i32
    %c8_i32_44 = arith.constant 8 : i32
    %118 = arith.muli %c3_i32, %c8_i32_44 : i32
    %119 = tpu.assume_multiple %118, 8 : i32
    %120 = arith.index_cast %119 : i32 to index
    %c0_45 = arith.constant 0 : index
    %121 = vector.load %arg8[%120, %c0_45] : memref<32x384xf32, #tpu.memory_space<vmem>>, vector<8x384xf32>
    %122 = vector.extract_strided_slice %121 {offsets = [0, 0], sizes = [8, 128], strides = [1, 1]} : vector<8x384xf32> to vector<8x128xf32>
    %123 = vector.extract_strided_slice %121 {offsets = [0, 128], sizes = [8, 128], strides = [1, 1]} : vector<8x384xf32> to vector<8x128xf32>
    %124 = vector.extract_strided_slice %121 {offsets = [0, 256], sizes = [8, 128], strides = [1, 1]} : vector<8x384xf32> to vector<8x128xf32>
    %125 = vector.broadcast %3 : vector<1x128xf32> to vector<8x128xf32>
    %126 = arith.mulf %125, %112 : vector<8x128xf32>
    %127 = arith.addf %122, %126 : vector<8x128xf32>
    %128 = math.tanh %127 : vector<8x128xf32>
    %cst_46 = arith.constant 5.000000e-01 : f32
    %129 = vector.broadcast %cst_46 : f32 to vector<8x128xf32>
    %130 = arith.mulf %129, %128 : vector<8x128xf32>
    %cst_47 = arith.constant 5.000000e-01 : f32
    %131 = vector.broadcast %cst_47 : f32 to vector<8x128xf32>
    %132 = arith.addf %130, %131 : vector<8x128xf32>
    %133 = vector.broadcast %4 : vector<1x128xf32> to vector<8x128xf32>
    %134 = arith.mulf %133, %112 : vector<8x128xf32>
    %135 = arith.addf %123, %134 : vector<8x128xf32>
    %136 = math.tanh %135 : vector<8x128xf32>
    %cst_48 = arith.constant 1.000000e+00 : f32
    %137 = vector.broadcast %cst_48 : f32 to vector<8x128xf32>
    %138 = arith.addf %137, %136 : vector<8x128xf32>
    %139 = arith.mulf %138, %112 : vector<8x128xf32>
    %140 = arith.addf %124, %139 : vector<8x128xf32>
    %141 = math.tanh %140 : vector<8x128xf32>
    %142 = arith.subf %112, %141 : vector<8x128xf32>
    %143 = arith.mulf %132, %142 : vector<8x128xf32>
    %144 = arith.addf %141, %143 : vector<8x128xf32>
    %145 = arith.addi %21, %c3_i32 : i32
    %146 = arith.index_cast %145 : i32 to index
    %c0_49 = arith.constant 0 : index
    %c0_50 = arith.constant 0 : index
    %147 = vector.load %arg6[%146, %c0_49, %c0_50] : memref<8x8x128xf32, #tpu.memory_space<vmem>>, vector<1x8x128xf32>
    %148 = vector.shape_cast %147 : vector<1x8x128xf32> to vector<8x128xf32>
    %149 = vector.shape_cast %144 : vector<8x128xf32> to vector<1x8x128xf32>
    tpu.vector_store %arg6[%146, %c0_49, %c0_50], %149 {strides = array<i32>} : memref<8x8x128xf32, #tpu.memory_space<vmem>>, vector<1x8x128xf32>,
    %c4_i32_51 = arith.constant 4 : i32
    %c2_i32_52 = arith.constant 2 : i32
    %150 = arith.addi %11, %c2_i32_52 : i32
    %c1_i32_53 = arith.constant 1 : i32
    %151 = arith.minsi %150, %c1_i32_53 : i32
    %c4_i32_54 = arith.constant 4 : i32
    %152 = arith.muli %151, %c4_i32_54 : i32
    %153 = tpu.assume_multiple %152, 4 : i32
    %c0_55 = arith.constant 0 : index
    %c0_56 = arith.constant 0 : index
    %154 = vector.load %arg4[%c0_55, %c0_56] : memref<9x384xf32, #tpu.memory_space<vmem>>, vector<9x384xf32>
    %155 = arith.index_cast %153 : i32 to index
    %c0_57 = arith.constant 0 : index
    %c0_58 = arith.constant 0 : index
    %156 = vector.load %arg2[%155, %c0_57, %c0_58] : memref<8x8x9xf32, #tpu.memory_space<vmem>>, vector<4x8x9xf32>
    %157 = vector.shape_cast %156 : vector<4x8x9xf32> to vector<32x9xf32>
    %cst_59 = arith.constant dense<0.000000e+00> : vector<32x384xf32>
    %158 = tpu.matmul %157, %154, %cst_59 {dimension_numbers = #tpu.dot_dimension_numbers<[1], [0], [0], [1], [0, 0, 1, 1], [], []>} : vector<32x9xf32>, vector<9x384xf32>, vector<32x384xf32> -> vector<32x384xf32>
    %c0_60 = arith.constant 0 : index
    %c0_61 = arith.constant 0 : index
    %159 = vector.load %arg8[%c0_60, %c0_61] : memref<32x384xf32, #tpu.memory_space<vmem>>, vector<32x384xf32>
    tpu.vector_store %arg8[%c0_60, %c0_61], %158 {strides = array<i32>} : memref<32x384xf32, #tpu.memory_space<vmem>>, vector<32x384xf32>,
    %c1_i32_62 = arith.constant 1 : i32
    %160 = arith.addi %11, %c1_i32_62 : i32
    %c4_i32_63 = arith.constant 4 : i32
    %161 = arith.muli %160, %c4_i32_63 : i32
    %c0_i32_64 = arith.constant 0 : i32
    %c8_i32_65 = arith.constant 8 : i32
    %162 = arith.muli %c0_i32_64, %c8_i32_65 : i32
    %163 = tpu.assume_multiple %162, 8 : i32
    %164 = arith.index_cast %163 : i32 to index
    %c0_66 = arith.constant 0 : index
    %165 = vector.load %arg9[%164, %c0_66] : memref<32x384xf32, #tpu.memory_space<vmem>>, vector<8x384xf32>
    %166 = vector.extract_strided_slice %165 {offsets = [0, 0], sizes = [8, 128], strides = [1, 1]} : vector<8x384xf32> to vector<8x128xf32>
    %167 = vector.extract_strided_slice %165 {offsets = [0, 128], sizes = [8, 128], strides = [1, 1]} : vector<8x384xf32> to vector<8x128xf32>
    %168 = vector.extract_strided_slice %165 {offsets = [0, 256], sizes = [8, 128], strides = [1, 1]} : vector<8x384xf32> to vector<8x128xf32>
    %169 = vector.broadcast %3 : vector<1x128xf32> to vector<8x128xf32>
    %170 = arith.mulf %169, %144 : vector<8x128xf32>
    %171 = arith.addf %166, %170 : vector<8x128xf32>
    %172 = math.tanh %171 : vector<8x128xf32>
    %cst_67 = arith.constant 5.000000e-01 : f32
    %173 = vector.broadcast %cst_67 : f32 to vector<8x128xf32>
    %174 = arith.mulf %173, %172 : vector<8x128xf32>
    %cst_68 = arith.constant 5.000000e-01 : f32
    %175 = vector.broadcast %cst_68 : f32 to vector<8x128xf32>
    %176 = arith.addf %174, %175 : vector<8x128xf32>
    %177 = vector.broadcast %4 : vector<1x128xf32> to vector<8x128xf32>
    %178 = arith.mulf %177, %144 : vector<8x128xf32>
    %179 = arith.addf %167, %178 : vector<8x128xf32>
    %180 = math.tanh %179 : vector<8x128xf32>
    %cst_69 = arith.constant 1.000000e+00 : f32
    %181 = vector.broadcast %cst_69 : f32 to vector<8x128xf32>
    %182 = arith.addf %181, %180 : vector<8x128xf32>
    %183 = arith.mulf %182, %144 : vector<8x128xf32>
    %184 = arith.addf %168, %183 : vector<8x128xf32>
    %185 = math.tanh %184 : vector<8x128xf32>
    %186 = arith.subf %144, %185 : vector<8x128xf32>
    %187 = arith.mulf %176, %186 : vector<8x128xf32>
    %188 = arith.addf %185, %187 : vector<8x128xf32>
    %189 = arith.addi %161, %c0_i32_64 : i32
    %190 = arith.index_cast %189 : i32 to index
    %c0_70 = arith.constant 0 : index
    %c0_71 = arith.constant 0 : index
    %191 = vector.load %arg6[%190, %c0_70, %c0_71] : memref<8x8x128xf32, #tpu.memory_space<vmem>>, vector<1x8x128xf32>
    %192 = vector.shape_cast %191 : vector<1x8x128xf32> to vector<8x128xf32>
    %193 = vector.shape_cast %188 : vector<8x128xf32> to vector<1x8x128xf32>
    tpu.vector_store %arg6[%190, %c0_70, %c0_71], %193 {strides = array<i32>} : memref<8x8x128xf32, #tpu.memory_space<vmem>>, vector<1x8x128xf32>,
    %c1_i32_72 = arith.constant 1 : i32
    %c8_i32_73 = arith.constant 8 : i32
    %194 = arith.muli %c1_i32_72, %c8_i32_73 : i32
    %195 = tpu.assume_multiple %194, 8 : i32
    %196 = arith.index_cast %195 : i32 to index
    %c0_74 = arith.constant 0 : index
    %197 = vector.load %arg9[%196, %c0_74] : memref<32x384xf32, #tpu.memory_space<vmem>>, vector<8x384xf32>
    %198 = vector.extract_strided_slice %197 {offsets = [0, 0], sizes = [8, 128], strides = [1, 1]} : vector<8x384xf32> to vector<8x128xf32>
    %199 = vector.extract_strided_slice %197 {offsets = [0, 128], sizes = [8, 128], strides = [1, 1]} : vector<8x384xf32> to vector<8x128xf32>
    %200 = vector.extract_strided_slice %197 {offsets = [0, 256], sizes = [8, 128], strides = [1, 1]} : vector<8x384xf32> to vector<8x128xf32>
    %201 = vector.broadcast %3 : vector<1x128xf32> to vector<8x128xf32>
    %202 = arith.mulf %201, %188 : vector<8x128xf32>
    %203 = arith.addf %198, %202 : vector<8x128xf32>
    %204 = math.tanh %203 : vector<8x128xf32>
    %cst_75 = arith.constant 5.000000e-01 : f32
    %205 = vector.broadcast %cst_75 : f32 to vector<8x128xf32>
    %206 = arith.mulf %205, %204 : vector<8x128xf32>
    %cst_76 = arith.constant 5.000000e-01 : f32
    %207 = vector.broadcast %cst_76 : f32 to vector<8x128xf32>
    %208 = arith.addf %206, %207 : vector<8x128xf32>
    %209 = vector.broadcast %4 : vector<1x128xf32> to vector<8x128xf32>
    %210 = arith.mulf %209, %188 : vector<8x128xf32>
    %211 = arith.addf %199, %210 : vector<8x128xf32>
    %212 = math.tanh %211 : vector<8x128xf32>
    %cst_77 = arith.constant 1.000000e+00 : f32
    %213 = vector.broadcast %cst_77 : f32 to vector<8x128xf32>
    %214 = arith.addf %213, %212 : vector<8x128xf32>
    %215 = arith.mulf %214, %188 : vector<8x128xf32>
    %216 = arith.addf %200, %215 : vector<8x128xf32>
    %217 = math.tanh %216 : vector<8x128xf32>
    %218 = arith.subf %188, %217 : vector<8x128xf32>
    %219 = arith.mulf %208, %218 : vector<8x128xf32>
    %220 = arith.addf %217, %219 : vector<8x128xf32>
    %221 = arith.addi %161, %c1_i32_72 : i32
    %222 = arith.index_cast %221 : i32 to index
    %c0_78 = arith.constant 0 : index
    %c0_79 = arith.constant 0 : index
    %223 = vector.load %arg6[%222, %c0_78, %c0_79] : memref<8x8x128xf32, #tpu.memory_space<vmem>>, vector<1x8x128xf32>
    %224 = vector.shape_cast %223 : vector<1x8x128xf32> to vector<8x128xf32>
    %225 = vector.shape_cast %220 : vector<8x128xf32> to vector<1x8x128xf32>
    tpu.vector_store %arg6[%222, %c0_78, %c0_79], %225 {strides = array<i32>} : memref<8x8x128xf32, #tpu.memory_space<vmem>>, vector<1x8x128xf32>,
    %c2_i32_80 = arith.constant 2 : i32
    %c8_i32_81 = arith.constant 8 : i32
    %226 = arith.muli %c2_i32_80, %c8_i32_81 : i32
    %227 = tpu.assume_multiple %226, 8 : i32
    %228 = arith.index_cast %227 : i32 to index
    %c0_82 = arith.constant 0 : index
    %229 = vector.load %arg9[%228, %c0_82] : memref<32x384xf32, #tpu.memory_space<vmem>>, vector<8x384xf32>
    %230 = vector.extract_strided_slice %229 {offsets = [0, 0], sizes = [8, 128], strides = [1, 1]} : vector<8x384xf32> to vector<8x128xf32>
    %231 = vector.extract_strided_slice %229 {offsets = [0, 128], sizes = [8, 128], strides = [1, 1]} : vector<8x384xf32> to vector<8x128xf32>
    %232 = vector.extract_strided_slice %229 {offsets = [0, 256], sizes = [8, 128], strides = [1, 1]} : vector<8x384xf32> to vector<8x128xf32>
    %233 = vector.broadcast %3 : vector<1x128xf32> to vector<8x128xf32>
    %234 = arith.mulf %233, %220 : vector<8x128xf32>
    %235 = arith.addf %230, %234 : vector<8x128xf32>
    %236 = math.tanh %235 : vector<8x128xf32>
    %cst_83 = arith.constant 5.000000e-01 : f32
    %237 = vector.broadcast %cst_83 : f32 to vector<8x128xf32>
    %238 = arith.mulf %237, %236 : vector<8x128xf32>
    %cst_84 = arith.constant 5.000000e-01 : f32
    %239 = vector.broadcast %cst_84 : f32 to vector<8x128xf32>
    %240 = arith.addf %238, %239 : vector<8x128xf32>
    %241 = vector.broadcast %4 : vector<1x128xf32> to vector<8x128xf32>
    %242 = arith.mulf %241, %220 : vector<8x128xf32>
    %243 = arith.addf %231, %242 : vector<8x128xf32>
    %244 = math.tanh %243 : vector<8x128xf32>
    %cst_85 = arith.constant 1.000000e+00 : f32
    %245 = vector.broadcast %cst_85 : f32 to vector<8x128xf32>
    %246 = arith.addf %245, %244 : vector<8x128xf32>
    %247 = arith.mulf %246, %220 : vector<8x128xf32>
    %248 = arith.addf %232, %247 : vector<8x128xf32>
    %249 = math.tanh %248 : vector<8x128xf32>
    %250 = arith.subf %220, %249 : vector<8x128xf32>
    %251 = arith.mulf %240, %250 : vector<8x128xf32>
    %252 = arith.addf %249, %251 : vector<8x128xf32>
    %253 = arith.addi %161, %c2_i32_80 : i32
    %254 = arith.index_cast %253 : i32 to index
    %c0_86 = arith.constant 0 : index
    %c0_87 = arith.constant 0 : index
    %255 = vector.load %arg6[%254, %c0_86, %c0_87] : memref<8x8x128xf32, #tpu.memory_space<vmem>>, vector<1x8x128xf32>
    %256 = vector.shape_cast %255 : vector<1x8x128xf32> to vector<8x128xf32>
    %257 = vector.shape_cast %252 : vector<8x128xf32> to vector<1x8x128xf32>
    tpu.vector_store %arg6[%254, %c0_86, %c0_87], %257 {strides = array<i32>} : memref<8x8x128xf32, #tpu.memory_space<vmem>>, vector<1x8x128xf32>,
    %c3_i32_88 = arith.constant 3 : i32
    %c8_i32_89 = arith.constant 8 : i32
    %258 = arith.muli %c3_i32_88, %c8_i32_89 : i32
    %259 = tpu.assume_multiple %258, 8 : i32
    %260 = arith.index_cast %259 : i32 to index
    %c0_90 = arith.constant 0 : index
    %261 = vector.load %arg9[%260, %c0_90] : memref<32x384xf32, #tpu.memory_space<vmem>>, vector<8x384xf32>
    %262 = vector.extract_strided_slice %261 {offsets = [0, 0], sizes = [8, 128], strides = [1, 1]} : vector<8x384xf32> to vector<8x128xf32>
    %263 = vector.extract_strided_slice %261 {offsets = [0, 128], sizes = [8, 128], strides = [1, 1]} : vector<8x384xf32> to vector<8x128xf32>
    %264 = vector.extract_strided_slice %261 {offsets = [0, 256], sizes = [8, 128], strides = [1, 1]} : vector<8x384xf32> to vector<8x128xf32>
    %265 = vector.broadcast %3 : vector<1x128xf32> to vector<8x128xf32>
    %266 = arith.mulf %265, %252 : vector<8x128xf32>
    %267 = arith.addf %262, %266 : vector<8x128xf32>
    %268 = math.tanh %267 : vector<8x128xf32>
    %cst_91 = arith.constant 5.000000e-01 : f32
    %269 = vector.broadcast %cst_91 : f32 to vector<8x128xf32>
    %270 = arith.mulf %269, %268 : vector<8x128xf32>
    %cst_92 = arith.constant 5.000000e-01 : f32
    %271 = vector.broadcast %cst_92 : f32 to vector<8x128xf32>
    %272 = arith.addf %270, %271 : vector<8x128xf32>
    %273 = vector.broadcast %4 : vector<1x128xf32> to vector<8x128xf32>
    %274 = arith.mulf %273, %252 : vector<8x128xf32>
    %275 = arith.addf %263, %274 : vector<8x128xf32>
    %276 = math.tanh %275 : vector<8x128xf32>
    %cst_93 = arith.constant 1.000000e+00 : f32
    %277 = vector.broadcast %cst_93 : f32 to vector<8x128xf32>
    %278 = arith.addf %277, %276 : vector<8x128xf32>
    %279 = arith.mulf %278, %252 : vector<8x128xf32>
    %280 = arith.addf %264, %279 : vector<8x128xf32>
    %281 = math.tanh %280 : vector<8x128xf32>
    %282 = arith.subf %252, %281 : vector<8x128xf32>
    %283 = arith.mulf %272, %282 : vector<8x128xf32>
    %284 = arith.addf %281, %283 : vector<8x128xf32>
    %285 = arith.addi %161, %c3_i32_88 : i32
    %286 = arith.index_cast %285 : i32 to index
    %c0_94 = arith.constant 0 : index
    %c0_95 = arith.constant 0 : index
    %287 = vector.load %arg6[%286, %c0_94, %c0_95] : memref<8x8x128xf32, #tpu.memory_space<vmem>>, vector<1x8x128xf32>
    %288 = vector.shape_cast %287 : vector<1x8x128xf32> to vector<8x128xf32>
    %289 = vector.shape_cast %284 : vector<8x128xf32> to vector<1x8x128xf32>
    tpu.vector_store %arg6[%286, %c0_94, %c0_95], %289 {strides = array<i32>} : memref<8x8x128xf32, #tpu.memory_space<vmem>>, vector<1x8x128xf32>,
    %c4_i32_96 = arith.constant 4 : i32
    %c1_i32_97 = arith.constant 1 : i32
    %c0_98 = arith.constant 0 : index
    %c0_99 = arith.constant 0 : index
    %290 = vector.load %arg7[%c0_98, %c0_99] : memref<8x128xf32, #tpu.memory_space<vmem>>, vector<8x128xf32>
    tpu.vector_store %arg7[%c0_98, %c0_99], %284 {strides = array<i32>} : memref<8x128xf32, #tpu.memory_space<vmem>>, vector<8x128xf32>,
    return
  }
  func.func @transform_0(%arg0: i32, %arg1: i32) -> (i32, i32, i32) {
    %c0_i32 = arith.constant 0 : i32
    %c0_i32_0 = arith.constant 0 : i32
    return %arg1, %arg0, %c0_i32 : i32, i32, i32
  }
  func.func @transform_1(%arg0: i32, %arg1: i32) -> (i32, i32) {
    %c0_i32 = arith.constant 0 : i32
    %c0_i32_0 = arith.constant 0 : i32
    return %arg0, %c0_i32 : i32, i32
  }
  func.func @transform_2(%arg0: i32, %arg1: i32) -> (i32, i32) {
    %c0_i32 = arith.constant 0 : i32
    %c0_i32_0 = arith.constant 0 : i32
    %c0_i32_1 = arith.constant 0 : i32
    return %c0_i32, %c0_i32_0 : i32, i32
  }
  func.func @transform_3(%arg0: i32, %arg1: i32) -> (i32, i32) {
    %c0_i32 = arith.constant 0 : i32
    %c0_i32_0 = arith.constant 0 : i32
    %c0_i32_1 = arith.constant 0 : i32
    return %c0_i32, %c0_i32_0 : i32, i32
  }
  func.func @transform_4(%arg0: i32, %arg1: i32) -> (i32, i32, i32) {
    %c0_i32 = arith.constant 0 : i32
    %c0_i32_0 = arith.constant 0 : i32
    return %arg1, %arg0, %c0_i32 : i32, i32, i32
  }
}

</mosaic_0001>

<bundles_post_ra>
// kernel: brc_forward.1
= control target key start
LH: loop header
LB: loop body
LE: loop exit
PB: predicated region body
PF: predicated region fallthrough
CT: control target
= control target key end

     0   :  { %vm48_vm0 = vcmask 1040384   ;;  %vm1066_vm1 = vmmov 1   ;;  %v1067_v3 = vmov 0.0   ;;  %vm35_vm3 = vcmask 72704   ;;  %s1329_s2 = inlined_call_operand.vmem [shape: f32[9,384], index: 2, kind: input, shape index: {}]   ;;  %s1330_s0 = inlined_call_operand.vmem [shape: f32[8,8,9], index: 0, kind: input, shape index: {}]   ;;  %s1331_s1 = inlined_call_operand.vmem [shape: f32[8,128], index: 1, kind: input, shape index: {}]   ;;  %s1332_s3 = inlined_call_operand.vmem [shape: f32[8,128], index: 3, kind: input, shape index: {}]   ;;  %s1333_s4 = inlined_call_operand.vmem [shape: f32[8,8,128], index: 4, kind: output, shape index: {}]  }
   0x1   :  { %v1096_v0 = vld [vmem:[%s1329_s2 + $0x8] sm:$0xff]  ;;  %v29_v1 = vld [vmem:[%s1329_s2 + $0x20] sm:$0x1]  ;;  %vm1101_vm2 = vmpackc.low %vm48_vm0, %vm1066_vm1  ;;  %122 = vmatprep.mubr.f32.mxu0 %v1067_v3  ;;  %140 = vmatprep.mubr.f32.mxu1 %v1067_v3 }
   0x2   :  { %v978_v4 = vpack.c.bf16 %v29_v1, %v1096_v0  ;;  %v1111_v5 = vld [vmem:[%s1329_s2] sm:$0xff]  ;;  %v28_v6 = vld [vmem:[%s1329_s2 + $0x18] sm:$0x1]  ;;  %v27_v8 = vld [vmem:[%s1329_s2 + $0x10] sm:$0xff] }
   0x3   :  { %v981_v7 = vpack.c.bf16 %v28_v6, %v1111_v5  ;;  %v30_v9 = vld [vmem:[%s1329_s2 + $0x28] sm:$0x1]  ;;  %v249_v11 = vld [vmem:[%s1329_s2 + $0x20] sm:$0x1]  ;;  %v34_v13 = vld [vmem:[%s1330_s0 + $0x18] sm:$0xff] }
   0x4   :  { %980 = vmatprep.subr.msk.bf16.mxu0 %vm1101_vm2, %v978_v4  ;;  %1014 = vmatprep.subr.msk.bf16.mxu1 %vm1101_vm2, %v978_v4  ;;  %v984_v10 = vpack.c.bf16 %v30_v9, %v27_v8  ;;  %v31_v12 = vld [vmem:[%s1330_s0] sm:$0xff]  ;;  %v250_v14 = vld [vmem:[%s1329_s2 + $0x28] sm:$0x1]  ;;  %v990_v15 = vpack.c.bf16 %v249_v11, %v1096_v0  ;;  %v248_v16 = vld [vmem:[%s1329_s2 + $0x18] sm:$0x1] }
   0x5   :  { %983 = vmatpush1.bf16.msk.msra.mxu0 %vm1101_vm2, %v981_v7  ;;  %1015 = vmatpush1.bf16.msk.msra.mxu1 %vm1101_vm2, %v981_v7  ;;  %v996_v17 = vpack.c.bf16 %v250_v14, %v27_v8  ;;  %v32_v18 = vld [vmem:[%s1330_s0 + $0x8] sm:$0xff]  ;;  %v993_v19 = vpack.c.bf16 %v248_v16, %v1111_v5  ;;  %v33_v20 = vld [vmem:[%s1330_s0 + $0x10] sm:$0xff]  ;;  %v891_v21 = vld [vmem:[%s1330_s0 + $0x20] sm:$0xff] }
   0x6   :  { %986 = vmatprep.subr.msk.bf16.mxu1 %vm1101_vm2, %v984_v10  ;;  %v892_v22 = vld [vmem:[%s1330_s0 + $0x28] sm:$0xff]  ;;  %v893_v23 = vld [vmem:[%s1330_s0 + $0x30] sm:$0xff]  ;;  %v894_v24 = vld [vmem:[%s1330_s0 + $0x38] sm:$0xff] }
   0x7   :  { %998 = vmatprep.subr.msk.bf16.mxu0 %vm1101_vm2, %v996_v17  ;;  %v567_v25 = vld [vmem:[%s1329_s2 + $0x20] sm:$0x1]  ;;  %v566_v27 = vld [vmem:[%s1329_s2 + $0x18] sm:$0x1]  ;;  %v568_v29 = vld [vmem:[%s1329_s2 + $0x28] sm:$0x1] }
   0x8   :  { %882 = vmatmul.mubr.msk.f32.vlgmr.msra.gmra.mrb[0].mxu0 %vm35_vm3, %v31_v12  ;;  %885 = vmatmul.mubr.msk.f32.vlgmr.msra.gmra.mrb[0].mxu1 %vm35_vm3, %v34_v13  ;;  %v1002_v26 = vpack.c.bf16 %v567_v25, %v1096_v0  ;;  %v1005_v28 = vpack.c.bf16 %v566_v27, %v1111_v5  ;;  %v1008_v30 = vpack.c.bf16 %v568_v29, %v27_v8  ;;  %v21_v31 = vld [vmem:[%s1331_s1] sm:$0xff] }
   0x9   :  { %989 = vmatpush3.bf16.msk.msra.mxu1 %vm1101_vm2, %v984_v10  ;;  %952 = vmatprep.mubr.msk.f32.mxu1 %vm35_vm3, %v31_v12  ;;  %v1237_v32 = vld [vmem:[%s1332_s3 + $0x1] ss:$0 sm:$0xff]  ;;  %v1247_v39 = vld [vmem:[%s1332_s3] ss:$0 sm:$0xff] }
   0xa   :  { %128 = vmatprep.mubr.f32.mxu0 %v1067_v3  ;;  %992 = vmatprep.subr.msk.bf16.mxu1 %vm1101_vm2, %v990_v15  ;;  %v483_v33 = vmul.f32 %v1237_v32, %v21_v31  ;;  %v474_v44 = vmul.f32 %v1247_v39, %v21_v31 }
   0xb   :  { %1001 = vmatpush3.bf16.msk.msra.mxu0 %vm1101_vm2, %v996_v17 }
   0xc   :  { %953 = vmatmul.mubr.msk.f32.vlgmr.msra.gmra.mrb[2].mxu1 %vm35_vm3, %v32_v18  ;;  %883 = vmatmul.mubr.msk.f32.gmra.mrb[2].mxu0 %vm35_vm3, %v32_v18 }
   0xd   :  { %134 = vmatprep.mubr.f32.mxu0 %v1067_v3  ;;  %955 = vmatprep.mubr.msk.f32.mxu1 %vm35_vm3, %v33_v20 }
   0xe   :  { %995 = vmatpush1.bf16.msk.msra.mxu1 %vm1101_vm2, %v993_v19  ;;  %1004 = vmatprep.subr.msk.bf16.mxu0 %vm1101_vm2, %v1002_v26 }
   0xf   :  { %1010 = vmatprep.subr.msk.bf16.mxu1 %vm1101_vm2, %v1008_v30 }
  0x10   :  { %884 = vmatmul.mubr.msk.f32.gmra.mrb[4].mxu0 %vm35_vm3, %v33_v20  ;;  %956 = vmatmul.mubr.msk.f32.gmra.mrb[4].mxu1 %vm35_vm3, %v34_v13 }
  0x11   :  { %342 = vmatprep.mubr.f32.mxu1 %v1067_v3  ;;  %962 = vmatprep.mubr.msk.f32.mxu0 %vm35_vm3, %v891_v21 }
  0x14   :  { %897 = vmatmul.mubr.msk.f32.vlgmr.msra.gmra.mrb[6].mxu1 %vm35_vm3, %v891_v21  ;;  %963 = vmatmul.mubr.msk.f32.vlgmr.msra.gmra.mrb[6].mxu0 %vm35_vm3, %v892_v22 }
  0x15   :  { %348 = vmatprep.mubr.f32.mxu1 %v1067_v3  ;;  %965 = vmatprep.mubr.msk.f32.mxu0 %vm35_vm3, %v893_v23 }
  0x16   :  { %1007 = vmatpush1.bf16.msk.msra.mxu0 %vm1101_vm2, %v1005_v28  ;;  %1013 = vmatpush3.bf16.msk.msra.mxu1 %vm1101_vm2, %v1008_v30 }
  0x18   :  { %898 = vmatmul.mubr.msk.f32.gmra.mrb[8].mxu1 %vm35_vm3, %v892_v22  ;;  %966 = vmatmul.mubr.msk.f32.gmra.mrb[8].mxu0 %vm35_vm3, %v894_v24 }
  0x19   :  { %354 = vmatprep.mubr.f32.mxu1 %v1067_v3  ;;  %658 = vmatprep.mubr.f32.mxu0 %v1067_v3 }
  0x1c   :  { %899 = vmatmul.mubr.msk.f32.gmra.mrb[10].mxu1 %vm35_vm3, %v893_v23  ;;  %917 = vmatmul.mubr.msk.f32.vlgmr.msra.gmra.mrb[10].mxu0 %vm35_vm3, %v891_v21 }
  0x1d   :  { %360 = vmatprep.mubr.f32.mxu1 %v1067_v3  ;;  %664 = vmatprep.mubr.f32.mxu0 %v1067_v3 }
  0x20   :  { %900 = vmatmul.mubr.msk.f32.gmra.mrb[12].mxu1 %vm35_vm3, %v894_v24  ;;  %918 = vmatmul.mubr.msk.f32.gmra.mrb[12].mxu0 %vm35_vm3, %v892_v22 }
  0x21   :  { %972 = vmatprep.mubr.msk.f32.mxu1 %vm35_vm3, %v891_v21  ;;  %670 = vmatprep.mubr.f32.mxu0 %v1067_v3 }
  0x24   :  { %973 = vmatmul.mubr.msk.f32.vlgmr.msra.gmra.mrb[14].mxu1 %vm35_vm3, %v892_v22  ;;  %919 = vmatmul.mubr.msk.f32.gmra.mrb[14].mxu0 %vm35_vm3, %v893_v23 }
  0x25   :  { %975 = vmatprep.mubr.msk.f32.mxu1 %vm35_vm3, %v893_v23  ;;  %676 = vmatprep.mubr.f32.mxu0 %v1067_v3 }
  0x28   :  { %976 = vmatmul.mubr.msk.f32.gmra.mrb[16].mxu1 %vm35_vm3, %v894_v24  ;;  %920 = vmatmul.mubr.msk.f32.gmra.mrb[16].mxu0 %vm35_vm3, %v894_v24 }
  0xdb   :  { %v124_v34 = vpop.f32.mrb[0].mxu0  ;;  %v1240_v35 = vpop.f32.mrb[0].mxu1 }
  0xdc   :  { %v126_v36 = vpop.f32.mrb[1].mxu0  ;;  %v1242_v37 = vpop.f32.mrb[1].mxu1  ;;  %v475_v49 = vadd.f32 %v474_v44, %v124_v34 }
  0xdd   :  { %v484_v38 = vadd.f32 %v483_v33, %v126_v36 }
  0xdf   :  { %1018 = vtanh.f32 %v484_v38  ;;  %v954_v40 = vpop.f32.mrb[2].mxu1  ;;  %v130_v41 = vpop.f32.mrb[2].mxu0 }
  0xe0   :  { %v213_v42 = vpop.f32.mrb[3].mxu1  ;;  %v132_v43 = vpop.f32.mrb[3].mxu0  ;;  %1020 = vtanh.f32 %v475_v49 }
  0xe3   :  { %v136_v45 = vpop.f32.mrb[4].mxu0  ;;  %v1250_v46 = vpop.f32.mrb[4].mxu1 }
  0xe4   :  { %v138_v47 = vpop.f32.mrb[5].mxu0  ;;  %v223_v48 = vpop.f32.mrb[5].mxu1 }
  0xe7   :  { %v1252_v55 = vpop.f32.mrb[6].mxu1  ;;  %v1261_v3 = vpop.f32.mrb[6].mxu0 }
  0xe8   :  { %v1254_v56 = vpop.f32.mrb[7].mxu1  ;;  %v1263_v4 = vpop.f32.mrb[7].mxu0 }
  0xe9   :  { %v1019_v50 = vpop.eup %1018 }
  0xea   :  { %v486_v51 = vadd.f32 1.0, %v1019_v50  ;;  %v1021_v54 = vpop.eup %1020 }
  0xeb   :  { %v477_v57 = vmul.f32 0.5, %v1021_v54  ;;  %v1265_v10 = vpop.f32.mrb[8].mxu1 }
  0xec   :  { %v487_v52 = vmul.f32 %v486_v51, %v21_v31  ;;  %v1267_v11 = vpop.f32.mrb[9].mxu1 }
  0xed   :  { %v478_v59 = vadd.f32 0.5, %v477_v57 }
  0xee   :  { %v488_v53 = vadd.f32 %v487_v52, %v213_v42 }
  0xef   :  { %v1274_v26 = vpop.f32.mrb[10].mxu1 }
  0xf0   :  { %1022 = vtanh.f32 %v488_v53  ;;  %v1276_v28 = vpop.f32.mrb[11].mxu1 }
  0xf3   :  { %v1290_v51 = vpop.f32.mrb[12].mxu1 }
  0xf4   :  { %v1292_v52 = vpop.f32.mrb[13].mxu1 }
  0xfa   :  { %v1023_v58 = vpop.eup %1022 }
  0xfb   :  { %v490_v60 = vsub.f32 %v21_v31, %v1023_v58 }
  0xfd   :  { %v491_v61 = vmul.f32 %v490_v60, %v478_v59 }
  0xff   :  { %v492_v62 = vadd.f32 %v1023_v58, %v491_v61 }
 0x101   :  { %493 = vst [vmem:[%s1333_s4] sm:$0xff] %v492_v62  ;;  %v500_v63 = vmul.f32 %v1247_v39, %v492_v62  ;;  %v505_v0 = vmul.f32 %v1237_v32, %v492_v62 }
 0x103   :  { %v501_v1 = vadd.f32 %v500_v63, %v130_v41  ;;  %v506_v2 = vadd.f32 %v505_v0, %v132_v43  ;;  %v1285_v43 = vpop.f32.mrb[8].mxu0 }
 0x104   :  { %v1287_v44 = vpop.f32.mrb[9].mxu0 }
 0x105   :  { %1024 = vtanh.f32 %v506_v2 }
 0x106   :  { %1026 = vtanh.f32 %v501_v1  ;;  %v974_v1 = vpop.f32.mrb[14].mxu1 }
 0x10f   :  { %v1025_v5 = vpop.eup %1024 }
 0x110   :  { %v508_v6 = vadd.f32 1.0, %v1025_v5  ;;  %v1027_v9 = vpop.eup %1026  ;;  %v749_v5 = vpop.f32.mrb[15].mxu1 }
 0x111   :  { %v503_v12 = vmul.f32 0.5, %v1027_v9  ;;  %v977_v9 = vpop.f32.mrb[16].mxu1 }
 0x112   :  { %v509_v7 = vmul.f32 %v508_v6, %v492_v62 }
 0x113   :  { %v504_v14 = vadd.f32 0.5, %v503_v12 }
 0x114   :  { %v510_v8 = vadd.f32 %v954_v40, %v509_v7 }
 0x116   :  { %1028 = vtanh.f32 %v510_v8 }
 0x120   :  { %v1029_v13 = vpop.eup %1028 }
 0x121   :  { %v512_v15 = vsub.f32 %v492_v62, %v1029_v13  ;;  %v660_v62 = vpop.f32.mrb[10].mxu0 }
 0x122   :  { %v662_v63 = vpop.f32.mrb[11].mxu0 }
 0x123   :  { %v513_v16 = vmul.f32 %v512_v15, %v504_v14  ;;  %v666_v0 = vpop.f32.mrb[12].mxu0 }
 0x124   :  { %v668_v2 = vpop.f32.mrb[13].mxu0 }
 0x125   :  { %v514_v17 = vadd.f32 %v1029_v13, %v513_v16  ;;  %v672_v8 = vpop.f32.mrb[14].mxu0  ;;  %v759_v13 = vpop.f32.mrb[17].mxu1 }
 0x126   :  { %v674_v12 = vpop.f32.mrb[15].mxu0 }
 0x127   :  { %908 = vst [vmem:[%s1333_s4 + $0x8] sm:$0xff] %v514_v17  ;;  %v523_v18 = vmul.f32 %v1247_v39, %v514_v17  ;;  %v528_v19 = vmul.f32 %v1237_v32, %v514_v17 }
 0x129   :  { %v524_v20 = vadd.f32 %v523_v18, %v136_v45  ;;  %v529_v21 = vadd.f32 %v528_v19, %v138_v47 }
 0x12b   :  { %1030 = vtanh.f32 %v529_v21 }
 0x12c   :  { %1032 = vtanh.f32 %v524_v20 }
 0x135   :  { %v1031_v22 = vpop.eup %1030 }
 0x136   :  { %v531_v23 = vadd.f32 1.0, %v1031_v22  ;;  %v1033_v27 = vpop.eup %1032 }
 0x137   :  { %v526_v29 = vmul.f32 0.5, %v1033_v27 }
 0x138   :  { %v532_v24 = vmul.f32 %v531_v23, %v514_v17 }
 0x139   :  { %v527_v31 = vadd.f32 0.5, %v526_v29 }
 0x13a   :  { %v533_v25 = vadd.f32 %v532_v24, %v223_v48 }
 0x13c   :  { %1034 = vtanh.f32 %v533_v25 }
 0x146   :  { %v1035_v30 = vpop.eup %1034 }
 0x147   :  { %v535_v33 = vsub.f32 %v514_v17, %v1035_v30 }
 0x149   :  { %v536_v34 = vmul.f32 %v535_v33, %v527_v31 }
 0x14b   :  { %v537_v36 = vadd.f32 %v1035_v30, %v536_v34 }
 0x14d   :  { %909 = vst [vmem:[%s1333_s4 + $0x10] sm:$0xff] %v537_v36  ;;  %v546_v38 = vmul.f32 %v1247_v39, %v537_v36  ;;  %v551_v40 = vmul.f32 %v1237_v32, %v537_v36 }
 0x14f   :  { %v547_v41 = vadd.f32 %v546_v38, %v1240_v35  ;;  %v552_v42 = vadd.f32 %v551_v40, %v1242_v37 }
 0x151   :  { %1036 = vtanh.f32 %v552_v42 }
 0x152   :  { %1038 = vtanh.f32 %v547_v41 }
 0x15b   :  { %v1037_v45 = vpop.eup %1036 }
 0x15c   :  { %v554_v47 = vadd.f32 1.0, %v1037_v45  ;;  %v1039_v50 = vpop.eup %1038 }
 0x15d   :  { %v549_v35 = vmul.f32 0.5, %v1039_v50 }
 0x15e   :  { %v555_v48 = vmul.f32 %v554_v47, %v537_v36 }
 0x15f   :  { %v550_v37 = vadd.f32 0.5, %v549_v35 }
 0x160   :  { %v556_v49 = vadd.f32 %v1250_v46, %v555_v48 }
 0x162   :  { %1040 = vtanh.f32 %v556_v49 }
 0x16c   :  { %v1041_v53 = vpop.eup %1040 }
 0x16d   :  { %v558_v54 = vsub.f32 %v537_v36, %v1041_v53 }
 0x16f   :  { %v559_v57 = vmul.f32 %v558_v54, %v550_v37 }
 0x171   :  { %v560_v58 = vadd.f32 %v1041_v53, %v559_v57 }
 0x173   :  { %910 = vst [vmem:[%s1333_s4 + $0x18] sm:$0xff] %v560_v58  ;;  %v785_v59 = vmul.f32 %v1247_v39, %v560_v58  ;;  %v790_v46 = vmul.f32 %v1237_v32, %v560_v58 }
 0x175   :  { %v786_v60 = vadd.f32 %v785_v59, %v1252_v55  ;;  %v791_v61 = vadd.f32 %v790_v46, %v1254_v56  ;;  %v678_v55 = vpop.f32.mrb[16].mxu0 }
 0x176   :  { %v680_v16 = vpop.f32.mrb[17].mxu0 }
 0x177   :  { %1042 = vtanh.f32 %v791_v61 }
 0x178   :  { %1044 = vtanh.f32 %v786_v60 }
 0x181   :  { %v1043_v6 = vpop.eup %1042 }
 0x182   :  { %v793_v7 = vadd.f32 1.0, %v1043_v6  ;;  %v1045_v56 = vpop.eup %1044 }
 0x183   :  { %v788_v17 = vmul.f32 0.5, %v1045_v56 }
 0x184   :  { %v794_v14 = vmul.f32 %v793_v7, %v560_v58 }
 0x185   :  { %v789_v19 = vadd.f32 0.5, %v788_v17 }
 0x186   :  { %v795_v15 = vadd.f32 %v794_v14, %v1263_v4 }
 0x188   :  { %1046 = vtanh.f32 %v795_v15 }
 0x192   :  { %v1047_v18 = vpop.eup %1046 }
 0x193   :  { %v797_v20 = vsub.f32 %v560_v58, %v1047_v18 }
 0x195   :  { %v798_v21 = vmul.f32 %v797_v20, %v789_v19 }
 0x197   :  { %v799_v22 = vadd.f32 %v1047_v18, %v798_v21 }
 0x199   :  { %926 = vst [vmem:[%s1333_s4 + $0x20] sm:$0xff] %v799_v22  ;;  %v807_v23 = vmul.f32 %v1247_v39, %v799_v22  ;;  %v812_v24 = vmul.f32 %v1237_v32, %v799_v22 }
 0x19b   :  { %v808_v4 = vadd.f32 %v807_v23, %v1265_v10  ;;  %v813_v25 = vadd.f32 %v812_v24, %v1267_v11 }
 0x19d   :  { %1048 = vtanh.f32 %v813_v25 }
 0x19e   :  { %1050 = vtanh.f32 %v808_v4 }
 0x1a7   :  { %v1049_v27 = vpop.eup %1048 }
 0x1a8   :  { %v815_v29 = vadd.f32 1.0, %v1049_v27  ;;  %v1051_v33 = vpop.eup %1050 }
 0x1a9   :  { %v810_v34 = vmul.f32 0.5, %v1051_v33 }
 0x1aa   :  { %v816_v30 = vmul.f32 %v815_v29, %v799_v22 }
 0x1ab   :  { %v811_v38 = vadd.f32 0.5, %v810_v34 }
 0x1ac   :  { %v817_v31 = vadd.f32 %v1261_v3, %v816_v30 }
 0x1ae   :  { %1052 = vtanh.f32 %v817_v31 }
 0x1b8   :  { %v1053_v36 = vpop.eup %1052 }
 0x1b9   :  { %v819_v40 = vsub.f32 %v799_v22, %v1053_v36 }
 0x1bb   :  { %v820_v41 = vmul.f32 %v819_v40, %v811_v38 }
 0x1bd   :  { %v821_v42 = vadd.f32 %v1053_v36, %v820_v41 }
 0x1bf   :  { %927 = vst [vmem:[%s1333_s4 + $0x28] sm:$0xff] %v821_v42  ;;  %v829_v10 = vmul.f32 %v1247_v39, %v821_v42  ;;  %v834_v11 = vmul.f32 %v1237_v32, %v821_v42 }
 0x1c1   :  { %v830_v45 = vadd.f32 %v829_v10, %v1274_v26  ;;  %v835_v3 = vadd.f32 %v834_v11, %v1276_v28 }
 0x1c3   :  { %1054 = vtanh.f32 %v835_v3 }
 0x1c4   :  { %1056 = vtanh.f32 %v830_v45 }
 0x1cd   :  { %v1055_v47 = vpop.eup %1054 }
 0x1ce   :  { %v837_v48 = vadd.f32 1.0, %v1055_v47  ;;  %v1057_v35 = vpop.eup %1056 }
 0x1cf   :  { %v832_v53 = vmul.f32 0.5, %v1057_v35 }
 0x1d0   :  { %v838_v49 = vmul.f32 %v837_v48, %v821_v42 }
 0x1d1   :  { %v833_v54 = vadd.f32 0.5, %v832_v53 }
 0x1d2   :  { %v839_v50 = vadd.f32 %v838_v49, %v1287_v44 }
 0x1d4   :  { %1058 = vtanh.f32 %v839_v50 }
 0x1de   :  { %v1059_v37 = vpop.eup %1058 }
 0x1df   :  { %v841_v57 = vsub.f32 %v821_v42, %v1059_v37 }
 0x1e1   :  { %v842_v58 = vmul.f32 %v841_v57, %v833_v54 }
 0x1e3   :  { %v843_v59 = vadd.f32 %v1059_v37, %v842_v58 }
 0x1e5   :  { %928 = vst [vmem:[%s1333_s4 + $0x30] sm:$0xff] %v843_v59  ;;  %v851_v26 = vmul.f32 %v1247_v39, %v843_v59  ;;  %v856_v28 = vmul.f32 %v1237_v32, %v843_v59 }
 0x1e7   :  { %v852_v46 = vadd.f32 %v851_v26, %v1290_v51  ;;  %v857_v44 = vadd.f32 %v856_v28, %v1292_v52 }
 0x1e9   :  { %1060 = vtanh.f32 %v857_v44 }
 0x1ea   :  { %1062 = vtanh.f32 %v852_v46 }
 0x1f3   :  { %v1061_v60 = vpop.eup %1060 }
 0x1f4   :  { %v859_v61 = vadd.f32 1.0, %v1061_v60  ;;  %v1063_v0 = vpop.eup %1062 }
 0x1f5   :  { %v854_v1 = vmul.f32 0.5, %v1063_v0 }
 0x1f6   :  { %v860_v62 = vmul.f32 %v859_v61, %v843_v59 }
 0x1f7   :  { %v855_v5 = vadd.f32 0.5, %v854_v1 }
 0x1f8   :  { %v861_v63 = vadd.f32 %v1285_v43, %v860_v62 }
 0x1fa   :  { %1064 = vtanh.f32 %v861_v63 }
 0x204   :  { %v1065_v2 = vpop.eup %1064 }
 0x205   :  { %v863_v6 = vsub.f32 %v843_v59, %v1065_v2 }
 0x207   :  { %v864_v39 = vmul.f32 %v863_v6, %v855_v5 }
 0x209   :  { %v865_v7 = vadd.f32 %v1065_v2, %v864_v39 }
 0x20b   :  { %929 = vst [vmem:[%s1333_s4 + $0x38] sm:$0xff] %v865_v7 }

</bundles_post_ra>
